<compile_context>
chip_gen: v7x
topology: tpu7x:2x2x1
jax: 0.10.0
libtpu: 0.0.40
codegen_flags: <defaults>
</compile_context>

<pallas_src>
import numpy as np
import jax
import jax.numpy as jnp
from jax.experimental import pallas as pl
from jax.experimental.pallas import tpu as pltpu

CUTOFF = 0.32178
EA_SCALE = 1.0 / (2.0 * 28.0 * CUTOFF)
EPS = 1e-15
PAD_NEG = -1e9        # log-weight of padded edges -> exp() underflows to 0


def _round_up(a, b):
    return ((a + b - 1) // b) * b


def _pick_vmem_limit():
    # v5e / v6e have 128 MiB physical VMEM -> raise the scoped limit;
    # v7x has only 64 MiB -> keep a conservative 32 MiB (also the safe default).
    try:
        kind = jax.devices()[0].device_kind.lower()
    except Exception:
        kind = ""
    if "v5" in kind or "v6" in kind:
        return 64 * 1024 * 1024
    return 32 * 1024 * 1024


VMEM_LIMIT = _pick_vmem_limit()


# ---------------------------------------------------------------------------
# Pallas kernel 1: node-side root term   xr = x @ root + bias
# (fin == 1 uses a VPU broadcast instead of a contraction-dim-1 MXU matmul)
# ---------------------------------------------------------------------------
def node_root_kernel(x_ref, root_ref, bias_ref, xr_ref):
    if x_ref.shape[1] == 1:
        xr_ref[...] = (x_ref[...].astype(jnp.float32)
                       * root_ref[...].astype(jnp.float32) + bias_ref[...])
    else:
        xr_ref[...] = (jnp.dot(x_ref[...].astype(jnp.bfloat16), root_ref[...],
                               preferred_element_type=jnp.float32)
                       + bias_ref[...])


# ---------------------------------------------------------------------------
# Pallas kernel 2: edge-side GMM aggregation (+ root/bias init, + ELU)
# Flattened 1-D grid over valid edge tiles.  Scalar prefetch (SMEM):
#   blk_ref[t]   : node block this edge tile scatters into (keys xr/out specs)
#   first_ref[t] : 1 on the first tile of a node block  -> init out with xr
#   last_ref[t]  : 1 on the last  tile of a node block  -> apply ELU
# The (tn, M) output block stays resident in VMEM across a block's tiles.
# ---------------------------------------------------------------------------
def gmm_edge_aggregate_kernel(blk_ref, first_ref, last_ref,
                              gfeat_ref, cmat_ref, xsrc_ref, g_ref,
                              lcol_ref, xr_ref, out_ref):
    t = pl.program_id(0)

    @pl.when(first_ref[t] == 1)
    def _init():                                   # root term + bias
        out_ref[...] = xr_ref[...]

    # gaussian mixture weights: [ea^2, ea, 1, log(1/deg)] @ C -> exp
    # The log-weight column folds the mean-aggregation 1/deg in f32 and drives
    # padded edges (log-w = -1e9) to gauss == 0 exactly (tiny MXU + EUP).
    gauss = jnp.exp(jnp.dot(gfeat_ref[...], cmat_ref[...],
                            preferred_element_type=jnp.float32))     # (te, Kp)

    if len(g_ref.shape) == 2:
        # fin == 1 (conv1):  msg = x_src * (gauss @ G),  G = (Kp, M)
        gm = jnp.dot(gauss, g_ref[...],
                     preferred_element_type=jnp.float32)             # (te, M)
        msg = xsrc_ref[...].astype(jnp.float32) * gm
    else:
        # general fin: msg = sum_k gauss_k * (x_src @ g_k).  The in-kernel x@g
        # keeps the per-edge HBM stream at fin raw features instead of K*M.
        xsrc = xsrc_ref[...]                                         # (te, fin) bf16
        num_k = g_ref.shape[0]
        msg = gauss[:, 0:1] * jnp.dot(xsrc, g_ref[0],
                                      preferred_element_type=jnp.float32)
        for k in range(1, num_k):
            msg = msg + gauss[:, k:k + 1] * jnp.dot(
                xsrc, g_ref[k], preferred_element_type=jnp.float32)  # (te, M)

    # scatter-sum into the resident node-block accumulator via an exact 0/1
    # bf16 one-hot (1/deg already folded into gauss; pad edges have msg == 0).
    tn_, te_ = out_ref.shape[0], msg.shape[0]
    n_iota = jax.lax.broadcasted_iota(jnp.int32, (tn_, te_), 0)
    scat = (n_iota == lcol_ref[...]).astype(jnp.bfloat16)
    out_ref[...] += jnp.dot(scat, msg.astype(jnp.bfloat16),
                            preferred_element_type=jnp.float32)

    @pl.when(last_ref[t] == 1)
    def _finalize():                               # overflow-safe ELU
        v = out_ref[...]
        out_ref[...] = jnp.where(v > 0.0, v,
                                 jnp.exp(jnp.minimum(v, 0.0)) - 1.0)


# ---------------------------------------------------------------------------
# Host-side edge preprocessing (vectorized numpy): sort edges by target node,
# group per node block, pad each block only to ITS OWN whole number of tiles
# and concatenate -> flattened tile list with per-tile block-id / first / last.
# TODO(synk): cache these per graph topology when the same graph is re-used.
# ---------------------------------------------------------------------------
def _prep_edges(edge_index, pos, n_nodes, tn, te, nb):
    row = np.asarray(edge_index[0]).astype(np.int64)
    col = np.asarray(edge_index[1]).astype(np.int64)
    pos_np = np.asarray(pos, dtype=np.float32)
    num_e = int(row.shape[0])
    dim = int(pos_np.shape[1])
    gf_pad = _round_up(2 * dim + 2, 8)
    const_c, logw_c = 2 * dim, 2 * dim + 1

    deg = np.bincount(col, minlength=n_nodes).astype(np.float32)

    order = np.argsort(col, kind="stable")
    row_s, col_s = row[order], col[order]

    # pseudo-coordinates expanded [ea^2, ea, ..., 1, log(1/deg)] for the C matmul
    ea = (pos_np[col_s] - pos_np[row_s]) * EA_SCALE + 0.5            # (E, D)
    feat = np.zeros((num_e, gf_pad), np.float32)
    feat[:, 0:2 * dim:2] = ea ** 2
    feat[:, 1:2 * dim:2] = ea
    feat[:, const_c] = 1.0
    feat[:, logw_c] = -np.log(np.maximum(deg[col_s], 1.0))

    blk = (col_s // tn).astype(np.int64)
    counts = np.bincount(blk, minlength=nb).astype(np.int64)
    tiles = np.maximum((counts + te - 1) // te, 1)   # >=1 tile per block
    n_tiles = int(tiles.sum())
    tile_blk = np.repeat(np.arange(nb), tiles).astype(np.int32)      # (T,)
    tile_base = np.concatenate([[0], np.cumsum(tiles)])[:-1]
    within = np.arange(n_tiles) - tile_base[tile_blk]
    first = (within == 0).astype(np.int32)
    last = (within == tiles[tile_blk] - 1).astype(np.int32)

    e_flat = n_tiles * te
    src_base = np.concatenate([[0], np.cumsum(counts)])[:-1]
    dest = (tile_base[blk] * te
            + (np.arange(num_e) - src_base[blk])).astype(np.int64)

    gfeat = np.zeros((e_flat, gf_pad), np.float32)
    gfeat[:, logw_c] = PAD_NEG                      # pad edges -> gauss == 0
    gfeat[dest] = feat
    lcol = np.zeros((1, e_flat), np.int32)
    lcol[0, dest] = (col_s - blk * tn).astype(np.int32)
    rsrc = np.zeros((e_flat,), np.int32)
    rsrc[dest] = row_s.astype(np.int32)
    return gfeat, lcol, rsrc, tile_blk, first, last, gf_pad, n_tiles


# ---------------------------------------------------------------------------
# GMMConv + ELU wrapper (node kernel -> raw-x gather -> edge/aggregation kernel)
# ---------------------------------------------------------------------------
def gmm_conv_elu(x, pos, edge_index, params, *, tn=256, te=1024):
    n_nodes, fin = int(x.shape[0]), int(x.shape[1])
    K, D = int(params["mu"].shape[0]), int(params["mu"].shape[1])
    M = int(params["root"].shape[1])
    k_pad = _round_up(K, 8)

    # node tiles: multiple of 8 sublanes; edge tiles: multiple of 128 lanes.
    tn = _round_up(min(int(tn), _round_up(n_nodes, 8)), 8)
    te = _round_up(int(te), 128)
    np_nodes = _round_up(n_nodes, tn)
    nb = np_nodes // tn

    # ---- host-side graph preprocessing (graph structure lives on host) ----
    (gfeat, lcol, rsrc, tile_blk, first, last, gf_pad, n_tiles) = _prep_edges(
        edge_index, pos, n_nodes, tn, te, nb)
    e_flat = gfeat.shape[0]

    # ---- node-side root term: xr = x @ root + bias ----
    w_dt = jnp.float32 if fin == 1 else jnp.bfloat16
    root_w = params["root"].astype(w_dt)                 # (fin, M)
    bias = params["bias"].reshape(1, M).astype(jnp.float32)
    x_pad = jnp.pad(x.astype(jnp.float32), ((0, np_nodes - n_nodes), (0, 0)))
    xr = pl.pallas_call(
        node_root_kernel,
        out_shape=jax.ShapeDtypeStruct((np_nodes, M), jnp.float32),
        grid=(nb,),
        in_specs=[pl.BlockSpec((tn, fin), lambda i: (i, 0)),
                  pl.BlockSpec((fin, M), lambda i: (0, 0)),
                  pl.BlockSpec((1, M), lambda i: (0, 0))],
        out_specs=pl.BlockSpec((tn, M), lambda i: (i, 0)),
        compiler_params=pltpu.CompilerParams(
            dimension_semantics=("parallel",),
            vmem_limit_bytes=VMEM_LIMIT),
        cost_estimate=pl.CostEstimate(
            flops=int(2 * np_nodes * fin * M),
            transcendentals=0,
            bytes_accessed=int(4 * np_nodes * (fin + M) + 4 * fin * M)),
    )(x_pad, root_w, bias)

    # gaussian coefficient matrix C:  logit = [ea^2, ea, 1, log(1/deg)] @ C
    mu = np.asarray(params["mu"], np.float32)
    sig = np.asarray(params["sigma"], np.float32)
    s = EPS + sig * sig                                  # (K, D)
    cmat = np.zeros((gf_pad, k_pad), np.float32)
    for d in range(D):
        cmat[2 * d, :K] = -0.5 / s[:, d]
        cmat[2 * d + 1, :K] = mu[:, d] / s[:, d]
    cmat[2 * D, :K] = -0.5 * np.sum(mu * mu / s, axis=1)
    cmat[2 * D + 1, :] = 1.0                             # log-weight fold row

    # GMM weights with k-major columns (column = k*M + m).
    # NOTE: verify this layout if importing weights from torch_geometric GMMConv.
    g_np = np.asarray(params["g"], np.float32)           # (fin, K*M)
    if fin == 1:
        g_arr = np.zeros((k_pad, M), np.float32)
        g_arr[:K] = g_np.reshape(K, M)
        g_arr = jnp.asarray(g_arr)
        g_spec = pl.BlockSpec((k_pad, M), lambda t, blk, fst, lst: (0, 0))
        src_dt, src_bytes = jnp.float32, 4
    else:
        g_arr = jnp.asarray(np.ascontiguousarray(
            g_np.reshape(fin, K, M).transpose(1, 0, 2))).astype(jnp.bfloat16)
        g_spec = pl.BlockSpec((K, fin, M), lambda t, blk, fst, lst: (0, 0, 0))
        src_dt, src_bytes = jnp.bfloat16, 2

    # per-edge gather of RAW source features only (fin floats/edge).
    # TODO(synk): the data-dependent x[row] gather stays in XLA.
    x_src = jnp.take(x.astype(src_dt), jnp.asarray(rsrc), axis=0)   # (e_flat, fin)

    edge_cost = pl.CostEstimate(
        flops=int(2 * e_flat * (gf_pad * k_pad + fin * K * M + tn * M)),
        transcendentals=int(e_flat * k_pad),
        bytes_accessed=int(e_flat * (4 * gf_pad + src_bytes * fin + 4)
                           + 2 * 4 * np_nodes * M + 4 * gf_pad * k_pad))

    grid_spec = pltpu.PrefetchScalarGridSpec(
        num_scalar_prefetch=3,
        grid=(n_tiles,),
        in_specs=[
            pl.BlockSpec((te, gf_pad), lambda t, blk, fst, lst: (t, 0)),
            pl.BlockSpec((gf_pad, k_pad), lambda t, blk, fst, lst: (0, 0)),
            pl.BlockSpec((te, fin), lambda t, blk, fst, lst: (t, 0)),
            g_spec,
            pl.BlockSpec((1, te), lambda t, blk, fst, lst: (0, t)),
            pl.BlockSpec((tn, M), lambda t, blk, fst, lst: (blk[t], 0)),
        ],
        out_specs=pl.BlockSpec((tn, M), lambda t, blk, fst, lst: (blk[t], 0)),
    )
    out_pad = pl.pallas_call(
        gmm_edge_aggregate_kernel,
        out_shape=jax.ShapeDtypeStruct((np_nodes, M), jnp.float32),
        grid_spec=grid_spec,
        compiler_params=pltpu.CompilerParams(
            dimension_semantics=("arbitrary",),
            vmem_limit_bytes=VMEM_LIMIT),
        cost_estimate=edge_cost,
    )(jnp.asarray(tile_blk), jnp.asarray(first), jnp.asarray(last),
      jnp.asarray(gfeat), jnp.asarray(cmat), x_src, g_arr,
      jnp.asarray(lcol), xr)
    return out_pad[:n_nodes]


# ---------------------------------------------------------------------------
# Pallas kernel 3: fc1 matmul (forward ends at `return fc1(x)`).
# Global mean pool uses segment_sum (no dense (B,N) pooling matrix).
# ---------------------------------------------------------------------------
def fc1_kernel(p_ref, w_ref, b_ref, o_ref):
    o_ref[...] = (jnp.dot(p_ref[...].astype(jnp.bfloat16), w_ref[...],
                          preferred_element_type=jnp.float32) + b_ref[...])


def global_mean_pool_fc1(x, batch, w1, b1):
    batch_np = np.asarray(batch)
    n_graphs = int(batch_np.max()) + 1
    batch_j = jnp.asarray(batch_np.astype(np.int32))
    counts = jnp.maximum(
        jax.ops.segment_sum(jnp.ones((x.shape[0],), jnp.float32), batch_j,
                            num_segments=n_graphs), 1.0)
    pooled = (jax.ops.segment_sum(x, batch_j, num_segments=n_graphs)
              / counts[:, None])

    b_pad = _round_up(n_graphs, 8)                  # sublane-aligned rows
    pooled_pad = jnp.pad(pooled, ((0, b_pad - n_graphs), (0, 0)))
    f_out = int(w1.shape[0])
    vmem = pl.BlockSpec(memory_space=pltpu.MemorySpace.VMEM)
    out = pl.pallas_call(
        fc1_kernel,
        out_shape=jax.ShapeDtypeStruct((b_pad, f_out), jnp.float32),
        in_specs=[vmem, vmem, vmem],
        out_specs=vmem,
        compiler_params=pltpu.CompilerParams(vmem_limit_bytes=VMEM_LIMIT),
        cost_estimate=pl.CostEstimate(
            flops=int(2 * b_pad * x.shape[1] * f_out),
            transcendentals=0,
            bytes_accessed=int(4 * (b_pad * x.shape[1] + x.shape[1] * f_out
                                    + b_pad * f_out))),
    )(pooled_pad, jnp.asarray(w1).T.astype(jnp.bfloat16),
      jnp.asarray(b1).reshape(1, -1).astype(jnp.float32))
    return out[:n_graphs]


# ---------------------------------------------------------------------------
# Glue (plain JAX / host numpy): normalized_cut_2d, graclus, max_pool
# ---------------------------------------------------------------------------
def normalized_cut_2d(edge_index, pos):
    row, col = edge_index
    d = pos[row] - pos[col]
    edge_attr = jnp.sqrt(jnp.sum(d * d, axis=1))
    deg = jax.ops.segment_sum(jnp.ones_like(edge_attr), row,
                              num_segments=pos.shape[0])
    inv = jnp.where(deg > 0, 1.0 / deg, 0.0)
    return edge_attr * (inv[row] + inv[col])


# TODO(synk): graclus greedy matching is sequential & data-dependent; no clean
# Pallas equivalent — deterministic host implementation (nodes in index order).
def graclus_host(edge_index, weight, num_nodes):
    row = np.asarray(edge_index[0])
    col = np.asarray(edge_index[1])
    w = np.asarray(weight)
    cluster = -np.ones(num_nodes, dtype=np.int64)
    nbrs = [[] for _ in range(num_nodes)]
    for e in range(row.shape[0]):
        nbrs[int(row[e])].append((int(col[e]), float(w[e])))
    cid = 0
    for u in range(num_nodes):
        if cluster[u] >= 0:
            continue
        cluster[u] = cid
        best, bw = -1, -np.inf
        for v, wv in nbrs[u]:
            if v != u and cluster[v] < 0 and wv > bw:
                best, bw = v, wv
        if best >= 0:
            cluster[best] = cid
        cid += 1
    return cluster.astype(np.int32), cid


# TODO(synk): max_pool edge coalescing (dynamic-shape dedupe) stays on host.
def max_pool_host(cluster, num_clusters, x, pos, batch, edge_index):
    cl = np.asarray(cluster)
    cl_j = jnp.asarray(cl)
    x_new = jax.ops.segment_max(x, cl_j, num_segments=num_clusters)
    counts = jnp.maximum(
        jax.ops.segment_sum(jnp.ones((x.shape[0],), jnp.float32), cl_j,
                            num_segments=num_clusters), 1.0)
    pos_new = (jax.ops.segment_sum(pos, cl_j, num_segments=num_clusters)
               / counts[:, None])
    batch_new = np.zeros(num_clusters, dtype=np.int32)
    batch_new[cl] = np.asarray(batch)
    row = cl[np.asarray(edge_index[0])]
    col = cl[np.asarray(edge_index[1])]
    mask = row != col
    pairs = np.unique(np.stack([row[mask], col[mask]], axis=1), axis=0)
    edge_index_new = jnp.asarray(pairs.T.astype(np.int32))
    return x_new, pos_new, batch_new, edge_index_new


# ---------------------------------------------------------------------------
# MoNet forward
# ---------------------------------------------------------------------------
def monet_forward(x, pos, edge_index, batch, params, *, tn=256, te=1024):
    # conv1 + ELU
    x = gmm_conv_elu(x, pos, edge_index, params["conv1"], tn=tn, te=te)
    w = normalized_cut_2d(edge_index, pos)
    cluster, nc = graclus_host(edge_index, w, x.shape[0])
    x, pos, batch, edge_index = max_pool_host(cluster, nc, x, pos, batch,
                                              edge_index)
    # conv2 + ELU
    x = gmm_conv_elu(x, pos, edge_index, params["conv2"], tn=tn, te=te)
    w = normalized_cut_2d(edge_index, pos)
    cluster, nc = graclus_host(edge_index, w, x.shape[0])
    x, pos, batch, edge_index = max_pool_host(cluster, nc, x, pos, batch,
                                              edge_index)
    # conv3 + ELU
    x = gmm_conv_elu(x, pos, edge_index, params["conv3"], tn=tn, te=te)
    # global mean pool + fc1 (forward returns fc1(x); the rest is dead code)
    return global_mean_pool_fc1(x, batch, params["fc1_w"], params["fc1_b"])


# ---------------------------------------------------------------------------
# Deterministic parameter init + synthetic input graph
# ---------------------------------------------------------------------------
def init_gmm_params(key, fin, fout, K, D=2):
    k1, k2, k3, k4 = jax.random.split(key, 4)
    return dict(
        g=0.1 * jax.random.normal(k1, (fin, fout * K), jnp.float32),
        mu=jax.random.uniform(k2, (K, D), jnp.float32),
        sigma=0.5 + 0.5 * jax.random.uniform(k3, (K, D), jnp.float32),
        root=0.1 * jax.random.normal(k4, (fin, fout), jnp.float32),
        bias=jnp.zeros((fout,), jnp.float32),
    )


def make_grid_graphs(h, w, num_graphs):
    edges, pos, batch = [], [], []
    for b in range(num_graphs):
        idx = np.arange(h * w).reshape(h, w) + b * h * w
        for i in range(h):
            for j in range(w):
                u = int(idx[i, j])
                pos.append((float(j), float(i)))
                batch.append(b)
                for di, dj in ((0, 1), (1, 0)):
                    ni, nj = i + di, j + dj
                    if ni < h and nj < w:
                        v = int(idx[ni, nj])
                        edges.append((u, v))
                        edges.append((v, u))
    edge_index = np.asarray(edges, dtype=np.int32).T           # (2, E)
    pos = np.asarray(pos, dtype=np.float32)                    # (N, 2)
    batch = np.asarray(batch, dtype=np.int32)                  # (N,)
    return edge_index, pos, batch


if __name__ == "__main__":
    K = 5                       # MoNet(kernel_size=5)
    key = jax.random.PRNGKey(0)
    kx, k1, k2, k3, k4, k5 = jax.random.split(key, 6)

    edge_index_np, pos_np, batch_np = make_grid_graphs(4, 4, 2)
    N = pos_np.shape[0]                                  # 32 nodes
    x = jax.random.normal(kx, (N, 1), jnp.float32)       # MNIST-style 1 feature
    pos = jnp.asarray(pos_np)
    edge_index = jnp.asarray(edge_index_np)

    params = dict(
        conv1=init_gmm_params(k1, 1, 32, K),
        conv2=init_gmm_params(k2, 32, 64, K),
        conv3=init_gmm_params(k3, 64, 64, K),
        fc1_w=0.1 * jax.random.normal(k4, (128, 64), jnp.float32),
        fc1_b=0.01 * jax.random.normal(k5, (128,), jnp.float32),
    )

    # small tiles so the toy graph exercises the multi-block / multi-tile path;
    # production graphs would use the defaults (tn=256, te=1024).
    out = monet_forward(x, pos, edge_index, batch_np, params, tn=8, te=128)
    out = jax.block_until_ready(out)
    assert out.shape == (2, 128) and out.dtype == jnp.float32
    assert bool(jnp.all(jnp.isfinite(out)))
    print("KERNEL_OK")
</pallas_src>

<mosaic_0001>
module attributes {stable_mosaic.version = 11 : i64} {
  func.func @node_root_kernel(%arg0: i32, %arg1: memref<8x1xf32, #tpu.memory_space<vmem>>, %arg2: memref<1x32xf32, #tpu.memory_space<vmem>>, %arg3: memref<1x32xf32, #tpu.memory_space<vmem>>, %arg4: memref<8x32xf32, #tpu.memory_space<vmem>>) attributes {dimension_semantics = [#tpu.dimension_semantics<parallel>], iteration_bounds = array<i64: 4>, scalar_prefetch = 0 : i64, scratch_operands = 0 : i64, tpu.core_type = #tpu.core_type<tc>, window_params = [{transform_indices = @transform_0, window_bounds = array<i64: 8, 1>}, {pipeline_mode = #tpu.pipeline_mode<synchronous>, transform_indices = @transform_1, window_bounds = array<i64: 1, 32>}, {pipeline_mode = #tpu.pipeline_mode<synchronous>, transform_indices = @transform_2, window_bounds = array<i64: 1, 32>}, {transform_indices = @transform_3, window_bounds = array<i64: 8, 32>}]} {
    %c0 = arith.constant 0 : index
    %c0_0 = arith.constant 0 : index
    %0 = vector.load %arg1[%c0, %c0_0] : memref<8x1xf32, #tpu.memory_space<vmem>>, vector<8x1xf32>
    %c0_1 = arith.constant 0 : index
    %c0_2 = arith.constant 0 : index
    %1 = vector.load %arg2[%c0_1, %c0_2] : memref<1x32xf32, #tpu.memory_space<vmem>>, vector<1x32xf32>
    %2 = vector.broadcast %0 : vector<8x1xf32> to vector<8x32xf32>
    %3 = vector.broadcast %1 : vector<1x32xf32> to vector<8x32xf32>
    %4 = arith.mulf %2, %3 : vector<8x32xf32>
    %c0_3 = arith.constant 0 : index
    %c0_4 = arith.constant 0 : index
    %5 = vector.load %arg3[%c0_3, %c0_4] : memref<1x32xf32, #tpu.memory_space<vmem>>, vector<1x32xf32>
    %6 = vector.broadcast %5 : vector<1x32xf32> to vector<8x32xf32>
    %7 = arith.addf %4, %6 : vector<8x32xf32>
    %c0_5 = arith.constant 0 : index
    %c0_6 = arith.constant 0 : index
    %8 = vector.load %arg4[%c0_5, %c0_6] : memref<8x32xf32, #tpu.memory_space<vmem>>, vector<8x32xf32>
    tpu.vector_store %arg4[%c0_5, %c0_6], %7 {strides = array<i32>} : memref<8x32xf32, #tpu.memory_space<vmem>>, vector<8x32xf32>,
    return
  }
  func.func @transform_0(%arg0: i32) -> (i32, i32) {
    %c0_i32 = arith.constant 0 : i32
    %c0_i32_0 = arith.constant 0 : i32
    return %arg0, %c0_i32 : i32, i32
  }
  func.func @transform_1(%arg0: i32) -> (i32, i32) {
    %c0_i32 = arith.constant 0 : i32
    %c0_i32_0 = arith.constant 0 : i32
    %c0_i32_1 = arith.constant 0 : i32
    return %c0_i32, %c0_i32_0 : i32, i32
  }
  func.func @transform_2(%arg0: i32) -> (i32, i32) {
    %c0_i32 = arith.constant 0 : i32
    %c0_i32_0 = arith.constant 0 : i32
    %c0_i32_1 = arith.constant 0 : i32
    return %c0_i32, %c0_i32_0 : i32, i32
  }
  func.func @transform_3(%arg0: i32) -> (i32, i32) {
    %c0_i32 = arith.constant 0 : i32
    %c0_i32_0 = arith.constant 0 : i32
    return %arg0, %c0_i32 : i32, i32
  }
}

</mosaic_0001>

<bundles_post_ra>
// kernel: tpu_custom_call.1
= control target key start
LH: loop header
LB: loop body
LE: loop exit
PB: predicated region body
PF: predicated region fallthrough
CT: control target
= control target key end

     0   :  { %8 = vsyncpa [#allocation3], 0  ;;  %s508_s0 = inlined_call_operand.vmem [shape: f32[32,1], index: 0, kind: input, shape index: {}]   ;;  %s509_s1 = inlined_call_operand.vmem [shape: f32[1,32], index: 1, kind: input, shape index: {}]   ;;  %s510_s2 = inlined_call_operand.vmem [shape: f32[1,32], index: 2, kind: input, shape index: {}]   ;;  %s511_s3 = inlined_call_operand.hbm [shape: f32[32,32], index: 3, kind: output, shape index: {}]  }
   0x1   :  { %10 = vsyncpa [#allocation3 + $0x1], 0  ;;  %s402_s12 = smov 0   ;;  %s404_s13 = smov 0  }
   0x2   :  { %s406_s14 = smov 0   ;;  %s408_s15 = smov 0  }
   0x3 LB: > { %s423_s16 = sadd.s32 4294967295, %s378_s15   ;;  %s263_s17 = sadd.s32 4294967294, %s378_s15   ;;  %s378_s15 = sphi %s408_s15, %s517_s15   ;;  %s374_s14 = sphi %s406_s14, %s516_s14   ;;  %s370_s13 = sphi %s404_s13, %s515_s13   ;;  %s366_s12 = sphi %s402_s12, %s514_s12  }
   0x4   : > { %s427_s18 = sadd.s32 1, %s378_s15   ;;  %s91_s19 = sadd.s32 1, %s374_s14 }
   0x5   : > { %s88_s20 = ssub.s32 %s378_s15, %s427_s18  ;;  %p101_p0 = scmp.ne.s32.totalorder %s374_s14, %s370_s13 }
   0x6   : > { %p89_p1 = scmp.eq.s32.totalorder %s88_s20, 0  ;;  %p102_p2 = scmp.eq.s32.totalorder %s423_s16, 3 }
   0x7   : > { %p107_p3 = scmp.ne.s32.totalorder %s370_s13, %s366_s12  ;;  %p108_p4 = scmp.eq.s32.totalorder %s263_s17, 3 }
   0x8   : > { %s438_s21 = scalar_select %p89_p1, %s374_s14, %s91_s19  }
   0x9   : > { %p440_p5 = por %p102_p2, %p101_p0  ;;  %p444_p6 = por %p108_p4, %p107_p3 }
   0xa   : > { %p266_p7 = scmp.ge.s32.totalorder %s378_s15, 1  ;;  %p139_p8 = scmp.lt.s32.totalorder %s378_s15, 5 }
   0xc   : > { %p140_p9 = pnand %p266_p7, %p139_p8 }
   0xd   : > { %p162_p10 = scmp.lt.s32.totalorder (!%p140_p9), %s423_s16, 3  ;;  %v380_v0 = vmov (!%p140_p9), 0   ;;  %s159_s29 = sand.u32 (!%p140_p9), 1, %s370_s13   ;;  %v269_v2 = vld [vmem:[%s509_s1] ss:$0 sm:$0xff] (!%p140_p9)  ;;  %vm188_vm0 = vcmask (!%p140_p9), 261120  }
   0xe   : > { %143 = sbr.rel (%p140_p9) target bundleno = 172 (0xac), region = 32  ;;  %315 = vset.pattern.permute.xlu0 (!%p140_p9), %v380_v0  ;;  %s267_s30 = sshll.u32 (!%p140_p9), %s159_s29, 3  ;;  %v270_v3 = vld [vmem:[%s510_s2] ss:$0 sm:$0xff] (!%p140_p9) }
   0xf   : > { %s272_s8 = sshll.u32 (!%p140_p9), %s423_s16, 7  ;;  %s161_s9 = scalar_lea.vmem (!%p140_p9), [#allocation2], %s267_s30 }
  0x10   : > { %s204_s10 = sshll.u32 (!%p140_p9), %s161_s9, 4  ;;  %s466_s19 = scalar_lea.hbm (!%p140_p9), %s511_s3, %s272_s8  ;;  %s468_s10 = int_to_ptr.vmem [resolvable:$true] %s204_s10 }
  0x11   : > { %s191_s20 = scalar_lea.sflag (!%p140_p9), [#allocation3], %s159_s29 }
  0x15   : > { %s163_s24 = scalar_select %p162_p10, %s423_s16, 3 }
  0x16   : > { %s381_s16 = smov [#allocation2]  }
  0x17   : > { %s268_s25 = sshll.u32 %s163_s24, 3  ;;  %s316_s24 = scalar_lea.vmem %s468_s10, 128 }
  0x18   : > { %s165_s28 = scalar_lea.vmem %s508_s0, %s268_s25  ;;  %p317_p11 = scmp.ne.s32.totalorder %s468_s10, %s316_s24 }
  0x19   : > { %v166_v1 = vld [vmem:[%s165_s28] sm:$0xff]  ;;  %s320_s25 = sshll.u32 %s381_s16, 4  ;;  %s321_s25 = int_to_ptr.vmem [resolvable:$false] %s320_s25 }
  0x1a   : > { %170 = vperm.xlu0 %315, %v166_v1   ;;  %p318_p12 = pnand %p317_p11, %p440_p5  ;;  %s322_s26 = scalar_lea.vmem %s321_s25, 256 }
  0x1b   : > { %p323_p0 = scmp.lt.s32.totalorder %s468_s10, %s321_s25  ;;  %p324_p1 = scmp.lt.s32.totalorder %s322_s26, %s316_s24 }
  0x1c   : > { %p319_p13 = pneg %p318_p12 }
  0x1d   : > { %p325_p2 = por %p324_p1, %p323_p0 }
  0x1f   : > { %p326_p3 = pnand %p325_p2, %p319_p13 }
  0x99   : > { %v171_v4 = vpop.permute.xlu0 %170 }
  0x9a   : > { %v179_v5 = vmul.f32 %v269_v2, %v171_v4 }
  0x9c   : > { %v187_v6 = vadd.f32 %v270_v3, %v179_v5 }
  0x9e   : > { %189 = vst.msk [vmem:[%s161_s9] sm:$0xff] %vm188_vm0, %v187_v6 }
  0x9f   : > { %329 = shalt.err (!%p326_p3)
}
  0xa0   : > { %s330_s27 = scalar_lea.hbm %s466_s19, 128  ;;  %s334_s30 = scalar_lea.hbm %s511_s3, 512 }
  0xa1   : > { %p331_p4 = scmp.ne.s32.totalorder %s466_s19, %s330_s27  ;;  %p335_p9 = scmp.lt.u32.totalorder %s466_s19, %s511_s3 }
  0xa2   : > { %p336_p10 = scmp.lt.u32.totalorder %s334_s30, %s330_s27  ;;  %p338_p12 = scmp.lt.u32.totalorder %s330_s27, %s466_s19 }
  0xa3   : > { %p332_p7 = pnand %p331_p4, %p440_p5 }
  0xa4   : > { %p337_p11 = por %p336_p10, %p335_p9 }
  0xa5   : > { %p333_p8 = pneg %p332_p7 }
  0xa6   : > { %p339_p13 = por %p338_p12, %p337_p11 }
  0xa8   : > { %p340_p0 = pnand %p339_p13, %p333_p8 }
  0xaa   : > { %343 = shalt.err (!%p340_p0)
}
  0xab   : > { %275 = dma.vmem_to_hbm [thread:$0]  (%p440_p5), %s468_s10, 128, %s466_s19, %s191_s20  }
  0xac PF: > { %p281_p1 = scmp.ge.s32.totalorder %s378_s15, 2  ;;  %s216_s6 = sand.u32 1, %s366_s12  }
  0xad   : > { %s217_s7 = scalar_lea.sflag [#allocation3], %s216_s6 }
  0xae   : > { %p278_p2 = pnand %p281_p1, %p444_p6 }
  0xb0   : > { %361 = dma.done.wait (!%p278_p2), %s217_s7, 128  }
  0xb1   : > { %363 = vsyncadd (!%p278_p2), %s217_s7, 4294967168  ;;  %p13_p3 = scmp.ge.s32.totalorder %s427_s18, 6   ;;  %s514_s12 = smov %s370_s13 }
  0xb2   : > { %s515_s13 = smov %s374_s14  ;;  %s516_s14 = smov %s438_s21 }
  0xb3   : > { %s517_s15 = smov %s427_s18  ;;  %15 = sbr.rel (!%p13_p3) target bundleno = 3 (0x3), region = 67 }
  0xba   :  { %222 = vsyncpa [#allocation3], 1 }
  0xbb   :  { %224 = vsyncpa [#allocation3 + $0x1], 1 }

</bundles_post_ra>
